<compile_context>
chip_gen: v7x
topology: tpu7x:2x2x1
jax: 0.10.0
libtpu: 0.0.40
codegen_flags: <defaults>
</compile_context>

<pallas_src>
import jax
import jax.numpy as jnp
import numpy as np
from jax import lax
from jax.experimental import pallas as pl
from jax.experimental.pallas import tpu as pltpu


def lstm_kernel(x_ref, wih_ref, whh_ref, b_ref, wl_ref, bl_ref,
                pred_ref, hn_ref, cn_ref, gx_ref):
    seq_len, input_size = x_ref.shape
    H = hn_ref.shape[-1]

    # ---- Prologue: hoist the input projection out of the recurrence. ------
    # One (seq_len, input_size) x (input_size, 4H) projection + fused bias for
    # all timesteps at once; the sequential loop below only needs h @ W_hh^T.
    if input_size == 1:
        # Degenerate K=1 contraction -> pure VPU broadcast outer product.
        gx = x_ref[...] * wih_ref[...]                     # (S,1)*(1,4H)->(S,4H)
    else:
        gx = jnp.dot(x_ref[...], wih_ref[...],
                     preferred_element_type=jnp.float32)
    gx_ref[...] = gx + b_ref[...]

    whh = whh_ref[...]                                     # (H, 4H), invariant

    # Lane mask for the "g" gate (tanh lanes), hoisted so the broadcast_iota
    # is built exactly once.
    lane = lax.broadcasted_iota(jnp.int32, (1, 4 * H), 1)
    is_g = (lane >= 2 * H) & (lane < 3 * H)

    def step(t, carry):
        h, c = carry
        gates = (gx_ref[pl.ds(t, 1), :]
                 + jnp.dot(h, whh, preferred_element_type=jnp.float32))
        # Full-width EUP activations + one VPU select, then slice.
        act = jnp.where(is_g, jnp.tanh(gates), jax.nn.sigmoid(gates))
        i = act[:, 0 * H:1 * H]
        f = act[:, 1 * H:2 * H]
        g = act[:, 2 * H:3 * H]
        o = act[:, 3 * H:4 * H]
        c_new = f * c + i * g
        h_new = o * jnp.tanh(c_new)
        return (h_new, c_new)

    # hidden = (zeros, zeros), matching the `hidden=None` path in torch.
    h0 = jnp.zeros((1, H), jnp.float32)
    c0 = jnp.zeros((1, H), jnp.float32)
    h, c = lax.fori_loop(0, seq_len, step, (h0, c0), unroll=True)

    # ---- Epilogue: linear head on the last hidden state + (h_n, c_n). ------
    pred_ref[...] = (jnp.dot(h, wl_ref[...], preferred_element_type=jnp.float32)
                     + bl_ref[...])
    hn_ref[...] = h
    cn_ref[...] = c


def lstm_forward(x, w_ih, w_hh, b_ih, b_hh, w_lin, b_lin):
    """x: (seq_len, input_size) f32.  Returns (pred_last, (h_n, c_n)) with
    PyTorch shapes: pred_last=(output_size,), h_n=c_n=(1,1,hidden_size)."""
    seq_len, input_size = x.shape
    four_h = w_ih.shape[0]
    H = four_h // 4
    out_size = w_lin.shape[0]

    # Transpose to matmul-friendly layout, fuse the two biases.
    wih_t = jnp.asarray(w_ih, jnp.float32).T                    # (input_size, 4H)
    whh_t = jnp.asarray(w_hh, jnp.float32).T                    # (H, 4H)
    b = (jnp.asarray(b_ih, jnp.float32)
         + jnp.asarray(b_hh, jnp.float32)).reshape(1, four_h)   # (1, 4H)
    wl_t = jnp.asarray(w_lin, jnp.float32).T                    # (H, out)
    bl = jnp.asarray(b_lin, jnp.float32).reshape(1, out_size)

    # Single kernel invocation (no grid): every input is small and fully
    # VMEM-resident; no per-step pipeline overhead and no double-buffering of
    # grid-invariant weights.
    pred, h_n, c_n = pl.pallas_call(
        lstm_kernel,
        out_shape=(
            jax.ShapeDtypeStruct((1, out_size), jnp.float32),
            jax.ShapeDtypeStruct((1, H), jnp.float32),
            jax.ShapeDtypeStruct((1, H), jnp.float32),
        ),
        scratch_shapes=[
            pltpu.VMEM((seq_len, four_h), jnp.float32),   # Gx (input projection)
        ],
    )(x.astype(jnp.float32), wih_t, whh_t, b, wl_t, bl)

    pred_last = pred.reshape(out_size)                    # predictions[-1]
    hidden = (h_n.reshape(1, 1, H), c_n.reshape(1, 1, H))
    return pred_last, hidden


def _reference(x, w_ih, w_hh, b_ih, b_hh, w_lin, b_lin):
    """Pure-numpy reference matching torch.nn.LSTM semantics (batch=1)."""
    seq_len, _ = x.shape
    H = w_hh.shape[1]
    h = np.zeros((1, H), np.float32)
    c = np.zeros((1, H), np.float32)
    sig = lambda z: 1.0 / (1.0 + np.exp(-z))
    for t in range(seq_len):
        g = x[t:t + 1] @ w_ih.T + h @ w_hh.T + b_ih + b_hh
        i = sig(g[:, 0 * H:1 * H]); f = sig(g[:, 1 * H:2 * H])
        gg = np.tanh(g[:, 2 * H:3 * H]); o = sig(g[:, 3 * H:4 * H])
        c = f * c + i * gg
        h = o * np.tanh(c)
    pred = h @ w_lin.T + b_lin
    return pred.reshape(-1), h, c


if __name__ == "__main__":
    input_size = 1
    hidden_size = 32
    output_size = 4
    seq_len = 8

    # Deterministic parameter init (no checkpoint needed).
    key = jax.random.PRNGKey(0)
    ks = jax.random.split(key, 7)
    s = 1.0 / np.sqrt(hidden_size)
    w_ih = jax.random.uniform(ks[0], (4 * hidden_size, input_size), jnp.float32, -s, s)
    w_hh = jax.random.uniform(ks[1], (4 * hidden_size, hidden_size), jnp.float32, -s, s)
    b_ih = jax.random.uniform(ks[2], (4 * hidden_size,), jnp.float32, -s, s)
    b_hh = jax.random.uniform(ks[3], (4 * hidden_size,), jnp.float32, -s, s)
    w_lin = jax.random.uniform(ks[4], (output_size, hidden_size), jnp.float32, -s, s)
    b_lin = jax.random.uniform(ks[5], (output_size,), jnp.float32, -s, s)

    # Input sequence analogous to the linspace in the original script.
    x = jnp.linspace(0.0, 10.0, seq_len, dtype=jnp.float32).reshape(-1, 1)

    pred, (h_n, c_n) = lstm_forward(x, w_ih, w_hh, b_ih, b_hh, w_lin, b_lin)
    jax.block_until_ready((pred, h_n, c_n))

    # Sanity check against a pure-numpy LSTM reference.
    ref_pred, ref_h, ref_c = _reference(
        np.asarray(x), np.asarray(w_ih), np.asarray(w_hh),
        np.asarray(b_ih), np.asarray(b_hh), np.asarray(w_lin), np.asarray(b_lin))
    assert np.allclose(np.asarray(pred), ref_pred, atol=1e-4, rtol=1e-4)
    assert np.allclose(np.asarray(h_n).reshape(1, -1), ref_h, atol=1e-4, rtol=1e-4)
    assert np.allclose(np.asarray(c_n).reshape(1, -1), ref_c, atol=1e-4, rtol=1e-4)

    print("KERNEL_OK")
</pallas_src>

<mosaic_0001>
module attributes {stable_mosaic.version = 11 : i64} {
  func.func @lstm_kernel(%arg0: memref<8x1xf32, #tpu.memory_space<vmem>>, %arg1: memref<1x128xf32, #tpu.memory_space<vmem>>, %arg2: memref<32x128xf32, #tpu.memory_space<vmem>>, %arg3: memref<1x128xf32, #tpu.memory_space<vmem>>, %arg4: memref<32x4xf32, #tpu.memory_space<vmem>>, %arg5: memref<1x4xf32, #tpu.memory_space<vmem>>, %arg6: memref<1x4xf32, #tpu.memory_space<vmem>>, %arg7: memref<1x32xf32, #tpu.memory_space<vmem>>, %arg8: memref<1x32xf32, #tpu.memory_space<vmem>>, %arg9: memref<8x128xf32, #tpu.memory_space<vmem>>) attributes {dimension_semantics = [], scalar_prefetch = 0 : i64, scratch_operands = 1 : i64, tpu.core_type = #tpu.core_type<tc>} {
    %c0 = arith.constant 0 : index
    %c0_0 = arith.constant 0 : index
    %0 = vector.load %arg0[%c0, %c0_0] : memref<8x1xf32, #tpu.memory_space<vmem>>, vector<8x1xf32>
    %c0_1 = arith.constant 0 : index
    %c0_2 = arith.constant 0 : index
    %1 = vector.load %arg1[%c0_1, %c0_2] : memref<1x128xf32, #tpu.memory_space<vmem>>, vector<1x128xf32>
    %2 = vector.broadcast %0 : vector<8x1xf32> to vector<8x128xf32>
    %3 = vector.broadcast %1 : vector<1x128xf32> to vector<8x128xf32>
    %4 = arith.mulf %2, %3 : vector<8x128xf32>
    %c0_3 = arith.constant 0 : index
    %c0_4 = arith.constant 0 : index
    %5 = vector.load %arg3[%c0_3, %c0_4] : memref<1x128xf32, #tpu.memory_space<vmem>>, vector<1x128xf32>
    %6 = vector.broadcast %5 : vector<1x128xf32> to vector<8x128xf32>
    %7 = arith.addf %4, %6 : vector<8x128xf32>
    %c0_5 = arith.constant 0 : index
    %c0_6 = arith.constant 0 : index
    %8 = vector.load %arg9[%c0_5, %c0_6] : memref<8x128xf32, #tpu.memory_space<vmem>>, vector<8x128xf32>
    tpu.vector_store %arg9[%c0_5, %c0_6], %7 {strides = array<i32>} : memref<8x128xf32, #tpu.memory_space<vmem>>, vector<8x128xf32>,
    %c0_7 = arith.constant 0 : index
    %c0_8 = arith.constant 0 : index
    %9 = vector.load %arg2[%c0_7, %c0_8] : memref<32x128xf32, #tpu.memory_space<vmem>>, vector<32x128xf32>
    %10 = tpu.iota {dimensions = array<i32: 1>} : vector<1x128xi32>
    %c64_i32 = arith.constant 64 : i32
    %11 = vector.broadcast %c64_i32 : i32 to vector<1x128xi32>
    %12 = arith.cmpi sge, %10, %11 : vector<1x128xi32>
    %c96_i32 = arith.constant 96 : i32
    %13 = vector.broadcast %c96_i32 : i32 to vector<1x128xi32>
    %14 = arith.cmpi slt, %10, %13 : vector<1x128xi32>
    %15 = arith.andi %12, %14 : vector<1x128xi1>
    %cst = arith.constant 0.000000e+00 : f32
    %16 = vector.broadcast %cst : f32 to vector<1x32xf32>
    %cst_9 = arith.constant 0.000000e+00 : f32
    %17 = vector.broadcast %cst_9 : f32 to vector<1x32xf32>
    %c0_i32 = arith.constant 0 : i32
    %18 = arith.index_cast %c0_i32 : i32 to index
    %c0_10 = arith.constant 0 : index
    %19 = vector.load %arg9[%18, %c0_10] : memref<8x128xf32, #tpu.memory_space<vmem>>, vector<1x128xf32>
    %cst_11 = arith.constant dense<0.000000e+00> : vector<1x128xf32>
    %20 = tpu.matmul %16, %9, %cst_11 {dimension_numbers = #tpu.dot_dimension_numbers<[1], [0], [0], [1], [0, 0, 1, 1], [], []>} : vector<1x32xf32>, vector<32x128xf32>, vector<1x128xf32> -> vector<1x128xf32>
    %21 = arith.addf %19, %20 : vector<1x128xf32>
    %22 = math.tanh %21 : vector<1x128xf32>
    %23 = arith.negf %21 : vector<1x128xf32>
    %24 = math.exp %23 : vector<1x128xf32>
    %cst_12 = arith.constant 1.000000e+00 : f32
    %25 = vector.broadcast %cst_12 : f32 to vector<1x128xf32>
    %26 = arith.addf %25, %24 : vector<1x128xf32>
    %27 = arith.divf %25, %26 : vector<1x128xf32>
    %28 = arith.select %15, %22, %27 : vector<1x128xi1>, vector<1x128xf32>
    %29 = vector.extract_strided_slice %28 {offsets = [0, 0], sizes = [1, 32], strides = [1, 1]} : vector<1x128xf32> to vector<1x32xf32>
    %30 = vector.extract_strided_slice %28 {offsets = [0, 32], sizes = [1, 32], strides = [1, 1]} : vector<1x128xf32> to vector<1x32xf32>
    %31 = vector.extract_strided_slice %28 {offsets = [0, 64], sizes = [1, 32], strides = [1, 1]} : vector<1x128xf32> to vector<1x32xf32>
    %32 = vector.extract_strided_slice %28 {offsets = [0, 96], sizes = [1, 32], strides = [1, 1]} : vector<1x128xf32> to vector<1x32xf32>
    %33 = arith.mulf %30, %17 : vector<1x32xf32>
    %34 = arith.mulf %29, %31 : vector<1x32xf32>
    %35 = arith.addf %33, %34 : vector<1x32xf32>
    %36 = math.tanh %35 : vector<1x32xf32>
    %37 = arith.mulf %32, %36 : vector<1x32xf32>
    %c1_i32 = arith.constant 1 : i32
    %38 = arith.index_cast %c1_i32 : i32 to index
    %c0_13 = arith.constant 0 : index
    %39 = vector.load %arg9[%38, %c0_13] : memref<8x128xf32, #tpu.memory_space<vmem>>, vector<1x128xf32>
    %cst_14 = arith.constant dense<0.000000e+00> : vector<1x128xf32>
    %40 = tpu.matmul %37, %9, %cst_14 {dimension_numbers = #tpu.dot_dimension_numbers<[1], [0], [0], [1], [0, 0, 1, 1], [], []>} : vector<1x32xf32>, vector<32x128xf32>, vector<1x128xf32> -> vector<1x128xf32>
    %41 = arith.addf %39, %40 : vector<1x128xf32>
    %42 = math.tanh %41 : vector<1x128xf32>
    %43 = arith.negf %41 : vector<1x128xf32>
    %44 = math.exp %43 : vector<1x128xf32>
    %cst_15 = arith.constant 1.000000e+00 : f32
    %45 = vector.broadcast %cst_15 : f32 to vector<1x128xf32>
    %46 = arith.addf %45, %44 : vector<1x128xf32>
    %47 = arith.divf %45, %46 : vector<1x128xf32>
    %48 = arith.select %15, %42, %47 : vector<1x128xi1>, vector<1x128xf32>
    %49 = vector.extract_strided_slice %48 {offsets = [0, 0], sizes = [1, 32], strides = [1, 1]} : vector<1x128xf32> to vector<1x32xf32>
    %50 = vector.extract_strided_slice %48 {offsets = [0, 32], sizes = [1, 32], strides = [1, 1]} : vector<1x128xf32> to vector<1x32xf32>
    %51 = vector.extract_strided_slice %48 {offsets = [0, 64], sizes = [1, 32], strides = [1, 1]} : vector<1x128xf32> to vector<1x32xf32>
    %52 = vector.extract_strided_slice %48 {offsets = [0, 96], sizes = [1, 32], strides = [1, 1]} : vector<1x128xf32> to vector<1x32xf32>
    %53 = arith.mulf %50, %35 : vector<1x32xf32>
    %54 = arith.mulf %49, %51 : vector<1x32xf32>
    %55 = arith.addf %53, %54 : vector<1x32xf32>
    %56 = math.tanh %55 : vector<1x32xf32>
    %57 = arith.mulf %52, %56 : vector<1x32xf32>
    %c2_i32 = arith.constant 2 : i32
    %58 = arith.index_cast %c2_i32 : i32 to index
    %c0_16 = arith.constant 0 : index
    %59 = vector.load %arg9[%58, %c0_16] : memref<8x128xf32, #tpu.memory_space<vmem>>, vector<1x128xf32>
    %cst_17 = arith.constant dense<0.000000e+00> : vector<1x128xf32>
    %60 = tpu.matmul %57, %9, %cst_17 {dimension_numbers = #tpu.dot_dimension_numbers<[1], [0], [0], [1], [0, 0, 1, 1], [], []>} : vector<1x32xf32>, vector<32x128xf32>, vector<1x128xf32> -> vector<1x128xf32>
    %61 = arith.addf %59, %60 : vector<1x128xf32>
    %62 = math.tanh %61 : vector<1x128xf32>
    %63 = arith.negf %61 : vector<1x128xf32>
    %64 = math.exp %63 : vector<1x128xf32>
    %cst_18 = arith.constant 1.000000e+00 : f32
    %65 = vector.broadcast %cst_18 : f32 to vector<1x128xf32>
    %66 = arith.addf %65, %64 : vector<1x128xf32>
    %67 = arith.divf %65, %66 : vector<1x128xf32>
    %68 = arith.select %15, %62, %67 : vector<1x128xi1>, vector<1x128xf32>
    %69 = vector.extract_strided_slice %68 {offsets = [0, 0], sizes = [1, 32], strides = [1, 1]} : vector<1x128xf32> to vector<1x32xf32>
    %70 = vector.extract_strided_slice %68 {offsets = [0, 32], sizes = [1, 32], strides = [1, 1]} : vector<1x128xf32> to vector<1x32xf32>
    %71 = vector.extract_strided_slice %68 {offsets = [0, 64], sizes = [1, 32], strides = [1, 1]} : vector<1x128xf32> to vector<1x32xf32>
    %72 = vector.extract_strided_slice %68 {offsets = [0, 96], sizes = [1, 32], strides = [1, 1]} : vector<1x128xf32> to vector<1x32xf32>
    %73 = arith.mulf %70, %55 : vector<1x32xf32>
    %74 = arith.mulf %69, %71 : vector<1x32xf32>
    %75 = arith.addf %73, %74 : vector<1x32xf32>
    %76 = math.tanh %75 : vector<1x32xf32>
    %77 = arith.mulf %72, %76 : vector<1x32xf32>
    %c3_i32 = arith.constant 3 : i32
    %78 = arith.index_cast %c3_i32 : i32 to index
    %c0_19 = arith.constant 0 : index
    %79 = vector.load %arg9[%78, %c0_19] : memref<8x128xf32, #tpu.memory_space<vmem>>, vector<1x128xf32>
    %cst_20 = arith.constant dense<0.000000e+00> : vector<1x128xf32>
    %80 = tpu.matmul %77, %9, %cst_20 {dimension_numbers = #tpu.dot_dimension_numbers<[1], [0], [0], [1], [0, 0, 1, 1], [], []>} : vector<1x32xf32>, vector<32x128xf32>, vector<1x128xf32> -> vector<1x128xf32>
    %81 = arith.addf %79, %80 : vector<1x128xf32>
    %82 = math.tanh %81 : vector<1x128xf32>
    %83 = arith.negf %81 : vector<1x128xf32>
    %84 = math.exp %83 : vector<1x128xf32>
    %cst_21 = arith.constant 1.000000e+00 : f32
    %85 = vector.broadcast %cst_21 : f32 to vector<1x128xf32>
    %86 = arith.addf %85, %84 : vector<1x128xf32>
    %87 = arith.divf %85, %86 : vector<1x128xf32>
    %88 = arith.select %15, %82, %87 : vector<1x128xi1>, vector<1x128xf32>
    %89 = vector.extract_strided_slice %88 {offsets = [0, 0], sizes = [1, 32], strides = [1, 1]} : vector<1x128xf32> to vector<1x32xf32>
    %90 = vector.extract_strided_slice %88 {offsets = [0, 32], sizes = [1, 32], strides = [1, 1]} : vector<1x128xf32> to vector<1x32xf32>
    %91 = vector.extract_strided_slice %88 {offsets = [0, 64], sizes = [1, 32], strides = [1, 1]} : vector<1x128xf32> to vector<1x32xf32>
    %92 = vector.extract_strided_slice %88 {offsets = [0, 96], sizes = [1, 32], strides = [1, 1]} : vector<1x128xf32> to vector<1x32xf32>
    %93 = arith.mulf %90, %75 : vector<1x32xf32>
    %94 = arith.mulf %89, %91 : vector<1x32xf32>
    %95 = arith.addf %93, %94 : vector<1x32xf32>
    %96 = math.tanh %95 : vector<1x32xf32>
    %97 = arith.mulf %92, %96 : vector<1x32xf32>
    %c4_i32 = arith.constant 4 : i32
    %98 = arith.index_cast %c4_i32 : i32 to index
    %c0_22 = arith.constant 0 : index
    %99 = vector.load %arg9[%98, %c0_22] : memref<8x128xf32, #tpu.memory_space<vmem>>, vector<1x128xf32>
    %cst_23 = arith.constant dense<0.000000e+00> : vector<1x128xf32>
    %100 = tpu.matmul %97, %9, %cst_23 {dimension_numbers = #tpu.dot_dimension_numbers<[1], [0], [0], [1], [0, 0, 1, 1], [], []>} : vector<1x32xf32>, vector<32x128xf32>, vector<1x128xf32> -> vector<1x128xf32>
    %101 = arith.addf %99, %100 : vector<1x128xf32>
    %102 = math.tanh %101 : vector<1x128xf32>
    %103 = arith.negf %101 : vector<1x128xf32>
    %104 = math.exp %103 : vector<1x128xf32>
    %cst_24 = arith.constant 1.000000e+00 : f32
    %105 = vector.broadcast %cst_24 : f32 to vector<1x128xf32>
    %106 = arith.addf %105, %104 : vector<1x128xf32>
    %107 = arith.divf %105, %106 : vector<1x128xf32>
    %108 = arith.select %15, %102, %107 : vector<1x128xi1>, vector<1x128xf32>
    %109 = vector.extract_strided_slice %108 {offsets = [0, 0], sizes = [1, 32], strides = [1, 1]} : vector<1x128xf32> to vector<1x32xf32>
    %110 = vector.extract_strided_slice %108 {offsets = [0, 32], sizes = [1, 32], strides = [1, 1]} : vector<1x128xf32> to vector<1x32xf32>
    %111 = vector.extract_strided_slice %108 {offsets = [0, 64], sizes = [1, 32], strides = [1, 1]} : vector<1x128xf32> to vector<1x32xf32>
    %112 = vector.extract_strided_slice %108 {offsets = [0, 96], sizes = [1, 32], strides = [1, 1]} : vector<1x128xf32> to vector<1x32xf32>
    %113 = arith.mulf %110, %95 : vector<1x32xf32>
    %114 = arith.mulf %109, %111 : vector<1x32xf32>
    %115 = arith.addf %113, %114 : vector<1x32xf32>
    %116 = math.tanh %115 : vector<1x32xf32>
    %117 = arith.mulf %112, %116 : vector<1x32xf32>
    %c5_i32 = arith.constant 5 : i32
    %118 = arith.index_cast %c5_i32 : i32 to index
    %c0_25 = arith.constant 0 : index
    %119 = vector.load %arg9[%118, %c0_25] : memref<8x128xf32, #tpu.memory_space<vmem>>, vector<1x128xf32>
    %cst_26 = arith.constant dense<0.000000e+00> : vector<1x128xf32>
    %120 = tpu.matmul %117, %9, %cst_26 {dimension_numbers = #tpu.dot_dimension_numbers<[1], [0], [0], [1], [0, 0, 1, 1], [], []>} : vector<1x32xf32>, vector<32x128xf32>, vector<1x128xf32> -> vector<1x128xf32>
    %121 = arith.addf %119, %120 : vector<1x128xf32>
    %122 = math.tanh %121 : vector<1x128xf32>
    %123 = arith.negf %121 : vector<1x128xf32>
    %124 = math.exp %123 : vector<1x128xf32>
    %cst_27 = arith.constant 1.000000e+00 : f32
    %125 = vector.broadcast %cst_27 : f32 to vector<1x128xf32>
    %126 = arith.addf %125, %124 : vector<1x128xf32>
    %127 = arith.divf %125, %126 : vector<1x128xf32>
    %128 = arith.select %15, %122, %127 : vector<1x128xi1>, vector<1x128xf32>
    %129 = vector.extract_strided_slice %128 {offsets = [0, 0], sizes = [1, 32], strides = [1, 1]} : vector<1x128xf32> to vector<1x32xf32>
    %130 = vector.extract_strided_slice %128 {offsets = [0, 32], sizes = [1, 32], strides = [1, 1]} : vector<1x128xf32> to vector<1x32xf32>
    %131 = vector.extract_strided_slice %128 {offsets = [0, 64], sizes = [1, 32], strides = [1, 1]} : vector<1x128xf32> to vector<1x32xf32>
    %132 = vector.extract_strided_slice %128 {offsets = [0, 96], sizes = [1, 32], strides = [1, 1]} : vector<1x128xf32> to vector<1x32xf32>
    %133 = arith.mulf %130, %115 : vector<1x32xf32>
    %134 = arith.mulf %129, %131 : vector<1x32xf32>
    %135 = arith.addf %133, %134 : vector<1x32xf32>
    %136 = math.tanh %135 : vector<1x32xf32>
    %137 = arith.mulf %132, %136 : vector<1x32xf32>
    %c6_i32 = arith.constant 6 : i32
    %138 = arith.index_cast %c6_i32 : i32 to index
    %c0_28 = arith.constant 0 : index
    %139 = vector.load %arg9[%138, %c0_28] : memref<8x128xf32, #tpu.memory_space<vmem>>, vector<1x128xf32>
    %cst_29 = arith.constant dense<0.000000e+00> : vector<1x128xf32>
    %140 = tpu.matmul %137, %9, %cst_29 {dimension_numbers = #tpu.dot_dimension_numbers<[1], [0], [0], [1], [0, 0, 1, 1], [], []>} : vector<1x32xf32>, vector<32x128xf32>, vector<1x128xf32> -> vector<1x128xf32>
    %141 = arith.addf %139, %140 : vector<1x128xf32>
    %142 = math.tanh %141 : vector<1x128xf32>
    %143 = arith.negf %141 : vector<1x128xf32>
    %144 = math.exp %143 : vector<1x128xf32>
    %cst_30 = arith.constant 1.000000e+00 : f32
    %145 = vector.broadcast %cst_30 : f32 to vector<1x128xf32>
    %146 = arith.addf %145, %144 : vector<1x128xf32>
    %147 = arith.divf %145, %146 : vector<1x128xf32>
    %148 = arith.select %15, %142, %147 : vector<1x128xi1>, vector<1x128xf32>
    %149 = vector.extract_strided_slice %148 {offsets = [0, 0], sizes = [1, 32], strides = [1, 1]} : vector<1x128xf32> to vector<1x32xf32>
    %150 = vector.extract_strided_slice %148 {offsets = [0, 32], sizes = [1, 32], strides = [1, 1]} : vector<1x128xf32> to vector<1x32xf32>
    %151 = vector.extract_strided_slice %148 {offsets = [0, 64], sizes = [1, 32], strides = [1, 1]} : vector<1x128xf32> to vector<1x32xf32>
    %152 = vector.extract_strided_slice %148 {offsets = [0, 96], sizes = [1, 32], strides = [1, 1]} : vector<1x128xf32> to vector<1x32xf32>
    %153 = arith.mulf %150, %135 : vector<1x32xf32>
    %154 = arith.mulf %149, %151 : vector<1x32xf32>
    %155 = arith.addf %153, %154 : vector<1x32xf32>
    %156 = math.tanh %155 : vector<1x32xf32>
    %157 = arith.mulf %152, %156 : vector<1x32xf32>
    %c7_i32 = arith.constant 7 : i32
    %158 = arith.index_cast %c7_i32 : i32 to index
    %c0_31 = arith.constant 0 : index
    %159 = vector.load %arg9[%158, %c0_31] : memref<8x128xf32, #tpu.memory_space<vmem>>, vector<1x128xf32>
    %cst_32 = arith.constant dense<0.000000e+00> : vector<1x128xf32>
    %160 = tpu.matmul %157, %9, %cst_32 {dimension_numbers = #tpu.dot_dimension_numbers<[1], [0], [0], [1], [0, 0, 1, 1], [], []>} : vector<1x32xf32>, vector<32x128xf32>, vector<1x128xf32> -> vector<1x128xf32>
    %161 = arith.addf %159, %160 : vector<1x128xf32>
    %162 = math.tanh %161 : vector<1x128xf32>
    %163 = arith.negf %161 : vector<1x128xf32>
    %164 = math.exp %163 : vector<1x128xf32>
    %cst_33 = arith.constant 1.000000e+00 : f32
    %165 = vector.broadcast %cst_33 : f32 to vector<1x128xf32>
    %166 = arith.addf %165, %164 : vector<1x128xf32>
    %167 = arith.divf %165, %166 : vector<1x128xf32>
    %168 = arith.select %15, %162, %167 : vector<1x128xi1>, vector<1x128xf32>
    %169 = vector.extract_strided_slice %168 {offsets = [0, 0], sizes = [1, 32], strides = [1, 1]} : vector<1x128xf32> to vector<1x32xf32>
    %170 = vector.extract_strided_slice %168 {offsets = [0, 32], sizes = [1, 32], strides = [1, 1]} : vector<1x128xf32> to vector<1x32xf32>
    %171 = vector.extract_strided_slice %168 {offsets = [0, 64], sizes = [1, 32], strides = [1, 1]} : vector<1x128xf32> to vector<1x32xf32>
    %172 = vector.extract_strided_slice %168 {offsets = [0, 96], sizes = [1, 32], strides = [1, 1]} : vector<1x128xf32> to vector<1x32xf32>
    %173 = arith.mulf %170, %155 : vector<1x32xf32>
    %174 = arith.mulf %169, %171 : vector<1x32xf32>
    %175 = arith.addf %173, %174 : vector<1x32xf32>
    %176 = math.tanh %175 : vector<1x32xf32>
    %177 = arith.mulf %172, %176 : vector<1x32xf32>
    %c8_i32 = arith.constant 8 : i32
    %c0_34 = arith.constant 0 : index
    %c0_35 = arith.constant 0 : index
    %178 = vector.load %arg4[%c0_34, %c0_35] : memref<32x4xf32, #tpu.memory_space<vmem>>, vector<32x4xf32>
    %cst_36 = arith.constant dense<0.000000e+00> : vector<1x4xf32>
    %179 = tpu.matmul %177, %178, %cst_36 {dimension_numbers = #tpu.dot_dimension_numbers<[1], [0], [0], [1], [0, 0, 1, 1], [], []>} : vector<1x32xf32>, vector<32x4xf32>, vector<1x4xf32> -> vector<1x4xf32>
    %c0_37 = arith.constant 0 : index
    %c0_38 = arith.constant 0 : index
    %180 = vector.load %arg5[%c0_37, %c0_38] : memref<1x4xf32, #tpu.memory_space<vmem>>, vector<1x4xf32>
    %181 = arith.addf %179, %180 : vector<1x4xf32>
    %c0_39 = arith.constant 0 : index
    %c0_40 = arith.constant 0 : index
    %182 = vector.load %arg6[%c0_39, %c0_40] : memref<1x4xf32, #tpu.memory_space<vmem>>, vector<1x4xf32>
    tpu.vector_store %arg6[%c0_39, %c0_40], %181 {strides = array<i32>} : memref<1x4xf32, #tpu.memory_space<vmem>>, vector<1x4xf32>,
    %c0_41 = arith.constant 0 : index
    %c0_42 = arith.constant 0 : index
    %183 = vector.load %arg7[%c0_41, %c0_42] : memref<1x32xf32, #tpu.memory_space<vmem>>, vector<1x32xf32>
    tpu.vector_store %arg7[%c0_41, %c0_42], %177 {strides = array<i32>} : memref<1x32xf32, #tpu.memory_space<vmem>>, vector<1x32xf32>,
    %c0_43 = arith.constant 0 : index
    %c0_44 = arith.constant 0 : index
    %184 = vector.load %arg8[%c0_43, %c0_44] : memref<1x32xf32, #tpu.memory_space<vmem>>, vector<1x32xf32>
    tpu.vector_store %arg8[%c0_43, %c0_44], %175 {strides = array<i32>} : memref<1x32xf32, #tpu.memory_space<vmem>>, vector<1x32xf32>,
    return
  }
}

</mosaic_0001>

<bundles_post_ra>
// kernel: tpu_custom_call.1
= control target key start
LH: loop header
LB: loop body
LE: loop exit
PB: predicated region body
PF: predicated region fallthrough
CT: control target
= control target key end

     0   :  { %14 = vsyncpa [#allocation4], 0  ;;  %v1367_v3 = vmov 0.0|0.0   ;;  %vm1368_vm0 = vmmov 0   ;;  %v1369_v6 = vmov 0.0   ;;  %v1370_v8 = vmov 0   ;;  %s1611_s0 = inlined_call_operand.vmem [shape: f32[8,1], index: 0, kind: input, shape index: {}]   ;;  %s1612_s1 = inlined_call_operand.vmem [shape: f32[1,128], index: 1, kind: input, shape index: {}]   ;;  %s1613_s2 = inlined_call_operand.vmem [shape: f32[32,128], index: 2, kind: input, shape index: {}]   ;;  %s1614_s3 = inlined_call_operand.vmem [shape: f32[1,128], index: 3, kind: input, shape index: {}]   ;;  %s1615_s4 = inlined_call_operand.vmem [shape: f32[32,4], index: 4, kind: input, shape index: {}]   ;;  %s1616_s5 = inlined_call_operand.vmem [shape: f32[1,4], index: 5, kind: input, shape index: {}]   ;;  %s1617_s6 = inlined_call_operand.hbm [shape: f32[1,4], index: 6, kind: output, shape index: {0}]   ;;  %s1618_s7 = inlined_call_operand.hbm [shape: f32[1,32], index: 7, kind: output, shape index: {1}]   ;;  %s1619_s8 = inlined_call_operand.hbm [shape: f32[1,32], index: 8, kind: output, shape index: {2}]  }
   0x1   :  { %v51_v0 = vld [vmem:[%s1613_s2] sm:$0xff]  ;;  %v52_v1 = vld [vmem:[%s1613_s2 + $0x8] sm:$0xff]  ;;  %v53_v2 = vld [vmem:[%s1613_s2 + $0x10] sm:$0xff]  ;;  %1168 = vmatprep.subr.bf16.mxu0 %v1367_v3  ;;  %1077 = vmatprep.mubr.msk.f32.mxu0 %vm1368_vm0, %v1369_v6 }
   0x2   :  { %v1432_v4 = vpack.c.bf16 %v52_v1, %v51_v0  ;;  %v54_v5 = vld [vmem:[%s1613_s2 + $0x18] sm:$0xff]  ;;  %v28_v7 = vld [vmem:[%s1611_s0] sm:$0xff]  ;;  %1232 = vset.pattern.permute.xlu0 %v1370_v8  ;;  %1174 = vmatprep.subr.bf16.mxu1 %v1367_v3 }
   0x3   :  { %15 = vsyncpa [#allocation6], 0  ;;  %v1444_v9 = vpack.c.bf16 %v54_v5, %v53_v2  ;;  %32 = vperm.xlu0 %1232, %v28_v7   ;;  %1088 = vmatprep.mubr.msk.f32.mxu1 %vm1368_vm0, %v1369_v6  ;;  %v1006_v10 = vld [vmem:[%s1612_s1] ss:$0 sm:$0xff]  ;;  %v55_v21 = vlaneseq  ;;  %s1371_s1 = smov 64   ;;  %vm61_vm4 = vcmask 261120  }
   0x4   :  { %1170 = vmatpush3.bf16.msra.mxu0 %v1432_v4  ;;  %1176 = vmatpush3.bf16.msra.mxu1 %v1432_v4  ;;  %v1007_v11 = vld [vmem:[%s1614_s3] ss:$0 sm:$0xff]  ;;  %s1372_s3 = smov 32   ;;  %v877_v24 = vld [vmem:[%s1615_s4 + $0x10] sm:$0xff]  ;;  %s1373_s25 = smov 96   ;;  %vm958_vm5 = vcmask 253952  }
   0x5   :  { %1171 = vmatprep.subr.bf16.mxu0 %v1367_v3  ;;  %1177 = vmatprep.subr.bf16.mxu1 %v1367_v3  ;;  %v56_v23 = vand.u32 127, %v55_v21 }
   0x7   :  { %vm57_vm1 = vcmp.ge.s32.totalorder %v56_v23, 64  ;;  %vm58_vm2 = vcmp.lt.s32.totalorder %v56_v23, 96 }
   0x8   :  { %1173 = vmatpush3.bf16.msra.mxu0 %v1444_v9  ;;  %1179 = vmatpush3.bf16.msra.mxu1 %v1444_v9  ;;  %vm1468_vm3 = vmand %vm57_vm1, %vm58_vm2 }
   0x9   :  { %1180 = vmatprep.subr.bf16.mxu0 %v1367_v3  ;;  %1186 = vmatprep.subr.bf16.mxu1 %v1367_v3 }
   0xb   :  { %1078 = vmatmul.mubr.f32.vlgmr.msra.gmra.mrb[0].mxu0 %v1369_v6 }
   0xc   :  { %1182 = vmatpush3.bf16.msra.mxu0 %v1432_v4  ;;  %1099 = vmatprep.mubr.msk.f32.mxu0 %vm1368_vm0, %v1369_v6 }
   0xd   :  { %1183 = vmatprep.subr.bf16.mxu0 %v1367_v3 }
  0x10   :  { %1185 = vmatpush3.bf16.msra.mxu0 %v1444_v9 }
  0x11   :  { %1192 = vmatprep.subr.bf16.mxu0 %v1367_v3 }
  0x82   :  { %v33_v12 = vpop.permute.xlu0 %32 }
  0x83   :  { %v41_v13 = vmul.f32 %v1006_v10, %v33_v12 }
  0x85   :  { %v49_v14 = vadd.f32 %v1007_v11, %v41_v13 }
  0x87   :  { %50 = vst [vmem:[#allocation2] sm:$0xff] %v49_v14 }
  0x8e   :  { %v60_v15 = vld [vmem:[#allocation2] sm:$0x1]  ;;  %v161_v37 = vld [vmem:[#allocation2 + $0x1] sm:$0x1]  ;;  %v263_v56 = vld [vmem:[#allocation2 + $0x2] sm:$0x1] }
  0xde   :  { %v131_v16 = vpop.f32.mrb[0].mxu0 }
  0xdf   :  { %v135_v17 = vadd.f32 %v131_v16, %v60_v15  ;;  %v1079_v18 = vpop.f32.mrb[1].mxu0  ;;  %v365_v15 = vld [vmem:[#allocation2 + $0x3] sm:$0x1] }
  0xe1   :  { %v1008_v19 = vmul.f32 -1.442695, %v135_v17 }
  0xe3   :  { %1233 = vpow2.f32 %v1008_v19 }
  0xe4   :  { %1235 = vtanh.f32 %v135_v17 }
  0xed   :  { %v1234_v20 = vpop.eup %1233 }
  0xee   :  { %v140_v22 = vadd.f32 1.0, %v1234_v20  ;;  %v1236_v25 = vpop.eup %1235 }
  0xf0   :  { %1237 = vrcp.f32 %v140_v22 }
  0xfa   :  { %v1238_v26 = vpop.eup %1237 }
  0xfb   :  { %v143_v27 = vsel %vm1468_vm3, %v1236_v25, %v1238_v26 }
  0xfc   :  { %146 = vrot.lane.b32.xlu0 %v143_v27, %s1371_s1  ;;  %v144_v30 = vmul.f32 0.0, %v143_v27 }
 0x16e   :  { %v147_v28 = vpop.permute.xlu0 %146 }
 0x16f   :  { %v149_v29 = vmul.f32 %v147_v28, %v143_v27 }
 0x171   :  { %151 = vrot.lane.b32.xlu1 %v149_v29, %s1372_s3 }
 0x1e3   :  { %v152_v31 = vpop.permute.xlu1 %151 }
 0x1e4   :  { %v154_v32 = vadd.f32 %v152_v31, %v144_v30 }
 0x1e6   :  { %1239 = vtanh.f32 %v154_v32 }
 0x1f0   :  { %v1240_v33 = vpop.eup %1239 }
 0x1f1   :  { %157 = vrot.lane.b32.xlu1 %v1240_v33, %s1371_s1 }
 0x263   :  { %v158_v34 = vpop.permute.xlu1 %157 }
 0x264   :  { %v160_v35 = vmul.f32 %v158_v34, %v143_v27 }
 0x266   :  { %163 = vrot.lane.b32.xlu0 %v160_v35, %s1372_s3  ;;  %v467_v35 = vld [vmem:[#allocation2 + $0x4] sm:$0x1] }
 0x2d8   :  { %v164_v36 = vpop.permute.xlu0 %163 }
 0x2d9   :  { %1089 = vmatmul.mubr.msk.f32.vlgmr.msra.gmra.mrb[0].mxu1 %vm61_vm4, %v164_v36 }
 0x2da   :  { %1188 = vmatpush3.bf16.msra.mxu1 %v1432_v4  ;;  %1110 = vmatprep.mubr.msk.f32.mxu1 %vm1368_vm0, %v1369_v6 }
 0x2db   :  { %1189 = vmatprep.subr.bf16.mxu1 %v1367_v3 }
 0x2de   :  { %1191 = vmatpush3.bf16.msra.mxu1 %v1444_v9 }
 0x2df   :  { %1198 = vmatprep.subr.bf16.mxu1 %v1367_v3 }
 0x3ac   :  { %v233_v38 = vpop.f32.mrb[0].mxu1 }
 0x3ad   :  { %v237_v39 = vadd.f32 %v233_v38, %v161_v37  ;;  %v1090_v40 = vpop.f32.mrb[1].mxu1 }
 0x3af   :  { %v1010_v41 = vmul.f32 -1.442695, %v237_v39 }
 0x3b1   :  { %1241 = vpow2.f32 %v1010_v41 }
 0x3b2   :  { %1243 = vtanh.f32 %v237_v39 }
 0x3bb   :  { %v1242_v42 = vpop.eup %1241 }
 0x3bc   :  { %v242_v43 = vadd.f32 1.0, %v1242_v42  ;;  %v1244_v44 = vpop.eup %1243 }
 0x3be   :  { %1245 = vrcp.f32 %v242_v43 }
 0x3c8   :  { %v1246_v45 = vpop.eup %1245 }
 0x3c9   :  { %v245_v46 = vsel %vm1468_vm3, %v1244_v44, %v1246_v45 }
 0x3ca   :  { %248 = vrot.lane.b32.xlu1 %v245_v46, %s1371_s1  ;;  %v246_v49 = vmul.f32 %v245_v46, %v154_v32 }
 0x43c   :  { %v249_v47 = vpop.permute.xlu1 %248 }
 0x43d   :  { %v251_v48 = vmul.f32 %v249_v47, %v245_v46 }
 0x43f   :  { %253 = vrot.lane.b32.xlu0 %v251_v48, %s1372_s3 }
 0x4b1   :  { %v254_v50 = vpop.permute.xlu0 %253 }
 0x4b2   :  { %v256_v51 = vadd.f32 %v254_v50, %v246_v49 }
 0x4b4   :  { %1247 = vtanh.f32 %v256_v51 }
 0x4be   :  { %v1248_v52 = vpop.eup %1247 }
 0x4bf   :  { %259 = vrot.lane.b32.xlu1 %v1248_v52, %s1371_s1 }
 0x531   :  { %v260_v53 = vpop.permute.xlu1 %259 }
 0x532   :  { %v262_v54 = vmul.f32 %v260_v53, %v245_v46 }
 0x534   :  { %265 = vrot.lane.b32.xlu0 %v262_v54, %s1372_s3  ;;  %v569_v54 = vld [vmem:[#allocation2 + $0x5] sm:$0x1] }
 0x5a6   :  { %v266_v55 = vpop.permute.xlu0 %265 }
 0x5a7   :  { %1100 = vmatmul.mubr.msk.f32.vlgmr.msra.gmra.mrb[2].mxu0 %vm61_vm4, %v266_v55 }
 0x5a8   :  { %1194 = vmatpush3.bf16.msra.mxu0 %v1432_v4  ;;  %1121 = vmatprep.mubr.msk.f32.mxu0 %vm1368_vm0, %v1369_v6 }
 0x5a9   :  { %1195 = vmatprep.subr.bf16.mxu0 %v1367_v3 }
 0x5ac   :  { %1197 = vmatpush3.bf16.msra.mxu0 %v1444_v9 }
 0x5ad   :  { %1204 = vmatprep.subr.bf16.mxu0 %v1367_v3 }
 0x67a   :  { %v335_v57 = vpop.f32.mrb[2].mxu0 }
 0x67b   :  { %v339_v58 = vadd.f32 %v335_v57, %v263_v56  ;;  %v1101_v59 = vpop.f32.mrb[3].mxu0 }
 0x67d   :  { %v1012_v60 = vmul.f32 -1.442695, %v339_v58 }
 0x67f   :  { %1249 = vpow2.f32 %v1012_v60 }
 0x680   :  { %1251 = vtanh.f32 %v339_v58 }
 0x689   :  { %v1250_v61 = vpop.eup %1249 }
 0x68a   :  { %v344_v62 = vadd.f32 1.0, %v1250_v61  ;;  %v1252_v63 = vpop.eup %1251 }
 0x68c   :  { %1253 = vrcp.f32 %v344_v62 }
 0x696   :  { %v1254_v0 = vpop.eup %1253 }
 0x697   :  { %v347_v1 = vsel %vm1468_vm3, %v1252_v63, %v1254_v0 }
 0x698   :  { %350 = vrot.lane.b32.xlu1 %v347_v1, %s1371_s1  ;;  %v348_v7 = vmul.f32 %v347_v1, %v256_v51 }
 0x70a   :  { %v351_v2 = vpop.permute.xlu1 %350 }
 0x70b   :  { %v353_v5 = vmul.f32 %v351_v2, %v347_v1 }
 0x70d   :  { %355 = vrot.lane.b32.xlu0 %v353_v5, %s1372_s3 }
 0x77f   :  { %v356_v8 = vpop.permute.xlu0 %355 }
 0x780   :  { %v358_v10 = vadd.f32 %v356_v8, %v348_v7 }
 0x782   :  { %1255 = vtanh.f32 %v358_v10 }
 0x78c   :  { %v1256_v11 = vpop.eup %1255 }
 0x78d   :  { %361 = vrot.lane.b32.xlu1 %v1256_v11, %s1371_s1  ;;  %v671_v11 = vld [vmem:[#allocation2 + $0x6] sm:$0x1] }
 0x7ff   :  { %v362_v12 = vpop.permute.xlu1 %361 }
 0x800   :  { %v364_v13 = vmul.f32 %v362_v12, %v347_v1 }
 0x802   :  { %367 = vrot.lane.b32.xlu0 %v364_v13, %s1372_s3 }
 0x874   :  { %v368_v14 = vpop.permute.xlu0 %367 }
 0x875   :  { %1111 = vmatmul.mubr.msk.f32.vlgmr.msra.gmra.mrb[2].mxu1 %vm61_vm4, %v368_v14 }
 0x876   :  { %1200 = vmatpush3.bf16.msra.mxu1 %v1432_v4  ;;  %1132 = vmatprep.mubr.msk.f32.mxu1 %vm1368_vm0, %v1369_v6 }
 0x877   :  { %1201 = vmatprep.subr.bf16.mxu1 %v1367_v3 }
 0x87a   :  { %1203 = vmatpush3.bf16.msra.mxu1 %v1444_v9 }
 0x87b   :  { %1210 = vmatprep.subr.bf16.mxu1 %v1367_v3 }
 0x948   :  { %v437_v16 = vpop.f32.mrb[2].mxu1 }
 0x949   :  { %v441_v17 = vadd.f32 %v437_v16, %v365_v15  ;;  %v1112_v18 = vpop.f32.mrb[3].mxu1 }
 0x94b   :  { %v1014_v19 = vmul.f32 -1.442695, %v441_v17 }
 0x94d   :  { %1257 = vpow2.f32 %v1014_v19 }
 0x94e   :  { %1259 = vtanh.f32 %v441_v17 }
 0x957   :  { %v1258_v20 = vpop.eup %1257 }
 0x958   :  { %v446_v21 = vadd.f32 1.0, %v1258_v20  ;;  %v1260_v22 = vpop.eup %1259 }
 0x95a   :  { %1261 = vrcp.f32 %v446_v21 }
 0x964   :  { %v1262_v23 = vpop.eup %1261 }
 0x965   :  { %v449_v25 = vsel %vm1468_vm3, %v1260_v22, %v1262_v23 }
 0x966   :  { %452 = vrot.lane.b32.xlu1 %v449_v25, %s1371_s1  ;;  %v450_v28 = vmul.f32 %v449_v25, %v358_v10 }
 0x9d8   :  { %v453_v26 = vpop.permute.xlu1 %452 }
 0x9d9   :  { %v455_v27 = vmul.f32 %v453_v26, %v449_v25 }
 0x9db   :  { %457 = vrot.lane.b32.xlu0 %v455_v27, %s1372_s3 }
 0xa4d   :  { %v458_v29 = vpop.permute.xlu0 %457 }
 0xa4e   :  { %v460_v30 = vadd.f32 %v458_v29, %v450_v28 }
 0xa50   :  { %1263 = vtanh.f32 %v460_v30 }
 0xa5a   :  { %v1264_v31 = vpop.eup %1263 }
 0xa5b   :  { %463 = vrot.lane.b32.xlu1 %v1264_v31, %s1371_s1 }
 0xacd   :  { %v464_v32 = vpop.permute.xlu1 %463 }
 0xace   :  { %v466_v33 = vmul.f32 %v464_v32, %v449_v25 }
 0xad0   :  { %469 = vrot.lane.b32.xlu0 %v466_v33, %s1372_s3 }
 0xb42   :  { %v470_v34 = vpop.permute.xlu0 %469 }
 0xb43   :  { %1122 = vmatmul.mubr.msk.f32.vlgmr.msra.gmra.mrb[4].mxu0 %vm61_vm4, %v470_v34 }
 0xb44   :  { %1206 = vmatpush3.bf16.msra.mxu0 %v1432_v4  ;;  %1143 = vmatprep.mubr.msk.f32.mxu0 %vm1368_vm0, %v1369_v6 }
 0xb45   :  { %1207 = vmatprep.subr.bf16.mxu0 %v1367_v3 }
 0xb48   :  { %1209 = vmatpush3.bf16.msra.mxu0 %v1444_v9 }
 0xb49   :  { %1216 = vmatprep.subr.bf16.mxu0 %v1367_v3 }
 0xc16   :  { %v539_v36 = vpop.f32.mrb[4].mxu0 }
 0xc17   :  { %v543_v37 = vadd.f32 %v539_v36, %v467_v35  ;;  %v1123_v38 = vpop.f32.mrb[5].mxu0 }
 0xc19   :  { %v1016_v39 = vmul.f32 -1.442695, %v543_v37 }
 0xc1b   :  { %1265 = vpow2.f32 %v1016_v39 }
 0xc1c   :  { %1267 = vtanh.f32 %v543_v37 }
 0xc25   :  { %v1266_v40 = vpop.eup %1265 }
 0xc26   :  { %v548_v41 = vadd.f32 1.0, %v1266_v40  ;;  %v1268_v42 = vpop.eup %1267 }
 0xc28   :  { %1269 = vrcp.f32 %v548_v41 }
 0xc32   :  { %v1270_v43 = vpop.eup %1269 }
 0xc33   :  { %v551_v44 = vsel %vm1468_vm3, %v1268_v42, %v1270_v43 }
 0xc34   :  { %554 = vrot.lane.b32.xlu1 %v551_v44, %s1371_s1  ;;  %v552_v47 = vmul.f32 %v551_v44, %v460_v30  ;;  %v773_v30 = vld [vmem:[#allocation2 + $0x7] sm:$0x1] }
 0xca6   :  { %v555_v45 = vpop.permute.xlu1 %554 }
 0xca7   :  { %v557_v46 = vmul.f32 %v555_v45, %v551_v44  ;;  %v875_v45 = vld [vmem:[%s1615_s4] sm:$0xff] }
 0xca9   :  { %559 = vrot.lane.b32.xlu0 %v557_v46, %s1372_s3  ;;  %v876_v46 = vld [vmem:[%s1615_s4 + $0x8] sm:$0xff] }
 0xd1b   :  { %v560_v48 = vpop.permute.xlu0 %559 }
 0xd1c   :  { %v562_v49 = vadd.f32 %v560_v48, %v552_v47  ;;  %v1217_v47 = vpack.c.bf16 %v876_v46, %v875_v45  ;;  %v878_v48 = vld [vmem:[%s1615_s4 + $0x18] sm:$0xff]  ;;  %s1374_s4 = smov [#allocation5]  }
 0xd1d   :  { %s981_s26 = sshll.u32 %s1374_s4, 4  ;;  %s982_s26 = int_to_ptr.vmem [resolvable:$true] %s981_s26 }
 0xd1e   :  { %1271 = vtanh.f32 %v562_v49  ;;  %s1297_s27 = scalar_lea.vmem %s982_s26, 16  ;;  %s1301_s28 = scalar_lea.vmem %s982_s26, 32 }
 0xd1f   :  { %p1298_p0 = scmp.ne.s32.totalorder %s982_s26, %s1297_s27  ;;  %p1302_p1 = scmp.lt.s32.totalorder %s982_s26, %s982_s26 }
 0xd20   :  { %p1303_p2 = scmp.lt.s32.totalorder %s1301_s28, %s1297_s27 }
 0xd22   :  { %p1304_p3 = por %p1303_p2, %p1302_p1 }
 0xd24   :  { %p1305_p4 = pnand %p1304_p3, %p1298_p0 }
 0xd28   :  { %v1272_v50 = vpop.eup %1271 }
 0xd29   :  { %565 = vrot.lane.b32.xlu1 %v1272_v50, %s1371_s1 }
 0xd9b   :  { %v566_v51 = vpop.permute.xlu1 %565 }
 0xd9c   :  { %v568_v52 = vmul.f32 %v566_v51, %v551_v44 }
 0xd9e   :  { %571 = vrot.lane.b32.xlu0 %v568_v52, %s1372_s3 }
 0xe10   :  { %v572_v53 = vpop.permute.xlu0 %571 }
 0xe11   :  { %1133 = vmatmul.mubr.msk.f32.vlgmr.msra.gmra.mrb[4].mxu1 %vm61_vm4, %v572_v53 }
 0xe12   :  { %1212 = vmatpush3.bf16.msra.mxu1 %v1432_v4  ;;  %1154 = vmatprep.mubr.msk.f32.mxu1 %vm1368_vm0, %v1369_v6 }
 0xe13   :  { %1213 = vmatprep.subr.bf16.mxu1 %v1367_v3 }
 0xe16   :  { %1215 = vmatpush3.bf16.msra.mxu1 %v1444_v9 }
 0xee4   :  { %v641_v55 = vpop.f32.mrb[4].mxu1 }
 0xee5   :  { %v645_v56 = vadd.f32 %v641_v55, %v569_v54  ;;  %v1134_v57 = vpop.f32.mrb[5].mxu1 }
 0xee7   :  { %v1018_v58 = vmul.f32 -1.442695, %v645_v56 }
 0xee9   :  { %1273 = vpow2.f32 %v1018_v58 }
 0xeea   :  { %1275 = vtanh.f32 %v645_v56 }
 0xef3   :  { %v1274_v59 = vpop.eup %1273 }
 0xef4   :  { %v650_v60 = vadd.f32 1.0, %v1274_v59  ;;  %v1276_v61 = vpop.eup %1275 }
 0xef6   :  { %1277 = vrcp.f32 %v650_v60 }
 0xf00   :  { %v1278_v62 = vpop.eup %1277 }
 0xf01   :  { %v653_v4 = vsel %vm1468_vm3, %v1276_v61, %v1278_v62 }
 0xf02   :  { %656 = vrot.lane.b32.xlu1 %v653_v4, %s1371_s1  ;;  %v654_v9 = vmul.f32 %v653_v4, %v562_v49  ;;  %v1220_v49 = vpack.c.bf16 %v878_v48, %v877_v24 }
 0xf74   :  { %v657_v63 = vpop.permute.xlu1 %656 }
 0xf75   :  { %v659_v0 = vmul.f32 %v657_v63, %v653_v4 }
 0xf77   :  { %661 = vrot.lane.b32.xlu0 %v659_v0, %s1372_s3 }
 0xfe9   :  { %v662_v1 = vpop.permute.xlu0 %661 }
 0xfea   :  { %v664_v2 = vadd.f32 %v662_v1, %v654_v9 }
 0xfec   :  { %1279 = vtanh.f32 %v664_v2 }
 0xff6   :  { %v1280_v5 = vpop.eup %1279 }
 0xff7   :  { %667 = vrot.lane.b32.xlu1 %v1280_v5, %s1371_s1 }
0x1069   :  { %v668_v7 = vpop.permute.xlu1 %667 }
0x106a   :  { %v670_v8 = vmul.f32 %v668_v7, %v653_v4 }
0x106c   :  { %673 = vrot.lane.b32.xlu0 %v670_v8, %s1372_s3 }
0x10de   :  { %v674_v10 = vpop.permute.xlu0 %673 }
0x10df   :  { %1144 = vmatmul.mubr.msk.f32.vlgmr.msra.gmra.mrb[6].mxu0 %vm61_vm4, %v674_v10 }
0x10e0   :  { %1165 = vmatprep.mubr.msk.f32.mxu0 %vm1368_vm0, %v1369_v6  ;;  %1218 = vmatpush3.bf16.msra.mxu0 %v1217_v47 }
0x10e1   :  { %1219 = vmatprep.subr.bf16.mxu0 %v1367_v3 }
0x10e4   :  { %1221 = vmatpush3.bf16.msra.mxu0 %v1220_v49 }
0x11b2   :  { %v743_v12 = vpop.f32.mrb[6].mxu0 }
0x11b3   :  { %v747_v13 = vadd.f32 %v743_v12, %v671_v11  ;;  %v1145_v14 = vpop.f32.mrb[7].mxu0 }
0x11b5   :  { %v1020_v15 = vmul.f32 -1.442695, %v747_v13 }
0x11b7   :  { %1281 = vpow2.f32 %v1020_v15 }
0x11b8   :  { %1283 = vtanh.f32 %v747_v13 }
0x11c1   :  { %v1282_v16 = vpop.eup %1281 }
0x11c2   :  { %v752_v17 = vadd.f32 1.0, %v1282_v16  ;;  %v1284_v18 = vpop.eup %1283 }
0x11c4   :  { %1285 = vrcp.f32 %v752_v17 }
0x11ce   :  { %v1286_v19 = vpop.eup %1285 }
0x11cf   :  { %v755_v20 = vsel %vm1468_vm3, %v1284_v18, %v1286_v19 }
0x11d0   :  { %758 = vrot.lane.b32.xlu1 %v755_v20, %s1371_s1  ;;  %v756_v6 = vmul.f32 %v755_v20, %v664_v2 }
0x1242   :  { %v759_v21 = vpop.permute.xlu1 %758 }
0x1243   :  { %v761_v22 = vmul.f32 %v759_v21, %v755_v20 }
0x1245   :  { %763 = vrot.lane.b32.xlu0 %v761_v22, %s1372_s3 }
0x12b7   :  { %v764_v23 = vpop.permute.xlu0 %763 }
0x12b8   :  { %v766_v25 = vadd.f32 %v764_v23, %v756_v6 }
0x12ba   :  { %1287 = vtanh.f32 %v766_v25 }
0x12c4   :  { %v1288_v26 = vpop.eup %1287 }
0x12c5   :  { %769 = vrot.lane.b32.xlu1 %v1288_v26, %s1371_s1 }
0x1337   :  { %v770_v27 = vpop.permute.xlu1 %769 }
0x1338   :  { %v772_v28 = vmul.f32 %v770_v27, %v755_v20 }
0x133a   :  { %775 = vrot.lane.b32.xlu0 %v772_v28, %s1372_s3 }
0x13ac   :  { %v776_v29 = vpop.permute.xlu0 %775 }
0x13ad   :  { %1155 = vmatmul.mubr.msk.f32.vlgmr.msra.gmra.mrb[6].mxu1 %vm61_vm4, %v776_v29 }
0x1480   :  { %v845_v31 = vpop.f32.mrb[6].mxu1 }
0x1481   :  { %v849_v32 = vadd.f32 %v845_v31, %v773_v30  ;;  %v1156_v33 = vpop.f32.mrb[7].mxu1 }
0x1483   :  { %v1022_v34 = vmul.f32 -1.442695, %v849_v32 }
0x1485   :  { %1289 = vpow2.f32 %v1022_v34 }
0x1486   :  { %1291 = vtanh.f32 %v849_v32 }
0x148f   :  { %v1290_v35 = vpop.eup %1289 }
0x1490   :  { %v854_v36 = vadd.f32 1.0, %v1290_v35  ;;  %v1292_v37 = vpop.eup %1291 }
0x1492   :  { %1293 = vrcp.f32 %v854_v36 }
0x149c   :  { %v1294_v38 = vpop.eup %1293 }
0x149d   :  { %v857_v39 = vsel %vm1468_vm3, %v1292_v37, %v1294_v38 }
0x149e   :  { %860 = vrot.lane.b32.xlu1 %v857_v39, %s1371_s1  ;;  %v858_v42 = vmul.f32 %v857_v39, %v766_v25 }
0x1510   :  { %v861_v40 = vpop.permute.xlu1 %860 }
0x1511   :  { %v863_v41 = vmul.f32 %v861_v40, %v857_v39 }
0x1513   :  { %865 = vrot.lane.b32.xlu0 %v863_v41, %s1372_s3 }
0x1585   :  { %v866_v43 = vpop.permute.xlu0 %865 }
0x1586   :  { %v868_v44 = vadd.f32 %v866_v43, %v858_v42 }
0x1588   :  { %1295 = vtanh.f32 %v868_v44 }
0x1592   :  { %v1296_v50 = vpop.eup %1295 }
0x1593   :  { %871 = vrot.lane.b32.xlu1 %v1296_v50, %s1371_s1 }
0x1597   :  { %961 = vrot.lane.b32.xlu1 %v868_v44, %s1373_s25 }
0x1605   :  { %v872_v51 = vpop.permute.xlu1 %871 }
0x1606   :  { %v874_v52 = vmul.f32 %v872_v51, %v857_v39 }
0x1608   :  { %881 = vrot.lane.b32.xlu0 %v874_v52, %s1372_s3 }
0x1609   :  { %v962_v53 = vpop.permute.xlu1 %961 }
0x160a   :  { %964 = vst.msk [vmem:[#allocation7] sm:$0x1] %vm958_vm5, %v962_v53 }
0x167a   :  { %v882_v54 = vpop.permute.xlu0 %881 }
0x167b   :  { %959 = vst.msk [vmem:[#allocation5] sm:$0x1] %vm958_vm5, %v882_v54  ;;  %1166 = vmatmul.mubr.msk.f32.vlgmr.msra.gmra.mrb[8].mxu0 %vm61_vm4, %v882_v54 }
0x167c   :  { %1308 = shalt.err (!%p1305_p4)
}
0x167d   :  { %s1309_s9 = scalar_lea.hbm %s1618_s7, 16 }
0x167e   :  { %p1310_p5 = scmp.ne.s32.totalorder %s1618_s7, %s1309_s9  ;;  %p1313_p6 = scmp.lt.u32.totalorder %s1309_s9, %s1618_s7 }
0x1680   :  { %p1315_p7 = pnand %p1313_p6, %p1310_p5 }
0x1682   :  { %1318 = shalt.err (!%p1315_p7)
}
0x1683   :  { %984 = dma.vmem_to_hbm [thread:$0]  %s982_s26, 16, %s1618_s7, [#allocation6]  }
0x1684   :  { %s1375_s2 = smov [#allocation7]  }
0x1685   :  { %s991_s15 = sshll.u32 %s1375_s2, 4  ;;  %s992_s15 = int_to_ptr.vmem [resolvable:$true] %s991_s15 }
0x1686   :  { %s1319_s16 = scalar_lea.vmem %s992_s15, 16  ;;  %s1323_s1 = scalar_lea.vmem %s992_s15, 32 }
0x1687   :  { %p1320_p8 = scmp.ne.s32.totalorder %s992_s15, %s1319_s16  ;;  %p1324_p9 = scmp.lt.s32.totalorder %s992_s15, %s992_s15 }
0x1688   :  { %p1325_p10 = scmp.lt.s32.totalorder %s1323_s1, %s1319_s16 }
0x168a   :  { %p1326_p11 = por %p1325_p10, %p1324_p9 }
0x168c   :  { %p1327_p12 = pnand %p1326_p11, %p1320_p8 }
0x168e   :  { %1330 = shalt.err (!%p1327_p12)
}
0x168f   :  { %s1331_s18 = scalar_lea.hbm %s1619_s8, 16 }
0x1690   :  { %p1332_p13 = scmp.ne.s32.totalorder %s1619_s8, %s1331_s18  ;;  %p1335_p0 = scmp.lt.u32.totalorder %s1331_s18, %s1619_s8 }
0x1692   :  { %p1337_p1 = pnand %p1335_p0, %p1332_p13 }
0x1694   :  { %1340 = shalt.err (!%p1337_p1)
}
0x1695   :  { %994 = dma.vmem_to_hbm [thread:$0]  %s992_s15, 16, %s1619_s8, [#allocation6]   ;;  %v879_v3 = vld [vmem:[%s1616_s5] sm:$0x1]  ;;  %vm955_vm6 = vcmask 24576  }
0x1696   :  { %s1376_s4 = smov [#allocation3]  }
0x1697   :  { %s971_s26 = sshll.u32 %s1376_s4, 4  ;;  %s972_s26 = int_to_ptr.vmem [resolvable:$true] %s971_s26 }
0x1698   :  { %s1341_s27 = scalar_lea.vmem %s972_s26, 16  ;;  %s1345_s28 = scalar_lea.vmem %s972_s26, 32 }
0x1699   :  { %p1342_p2 = scmp.ne.s32.totalorder %s972_s26, %s1341_s27  ;;  %p1346_p3 = scmp.lt.s32.totalorder %s972_s26, %s972_s26 }
0x169a   :  { %p1347_p4 = scmp.lt.s32.totalorder %s1345_s28, %s1341_s27 }
0x169c   :  { %p1348_p5 = por %p1347_p4, %p1346_p3 }
0x169e   :  { %p1349_p6 = pnand %p1348_p5, %p1342_p2 }
0x174e   :  { %v951_v55 = vpop.f32.mrb[8].mxu0 }
0x174f   :  { %v952_v56 = vadd.f32 %v951_v55, %v879_v3  ;;  %v1167_v57 = vpop.f32.mrb[9].mxu0 }
0x1751   :  { %956 = vst.msk [vmem:[#allocation3] sm:$0x1] %vm955_vm6, %v952_v56 }
0x1752   :  { %1352 = shalt.err (!%p1349_p6)
}
0x1753   :  { %s1353_s5 = scalar_lea.hbm %s1617_s6, 16 }
0x1754   :  { %p1354_p7 = scmp.ne.s32.totalorder %s1617_s6, %s1353_s5  ;;  %p1357_p8 = scmp.lt.u32.totalorder %s1353_s5, %s1617_s6 }
0x1756   :  { %p1359_p9 = pnand %p1357_p8, %p1354_p7 }
0x1758   :  { %1362 = shalt.err (!%p1359_p9)
}
0x1759   :  { %974 = dma.vmem_to_hbm [thread:$0]  %s972_s26, 16, %s1617_s6, [#allocation4]  }
0x175a   :  { %1363 = dma.done.wait [#allocation4], 16  }
0x175b   :  { %1364 = vsyncadd [#allocation4], 4294967280 }
0x175c   :  { %1365 = dma.done.wait [#allocation6], 32  }
0x175d   :  { %1366 = vsyncadd [#allocation6], 4294967264 }
0x175e   :  { %1004 = vsyncpa [#allocation4], 1 }
0x175f   :  { %1005 = vsyncpa [#allocation6], 1 }

</bundles_post_ra>
